<compile_context>
chip_gen: v7x
topology: tpu7x:2x2x1
jax: 0.10.0
libtpu: 0.0.40
codegen_flags: <defaults>
</compile_context>

<pallas_src>
import functools

import jax
import jax.numpy as jnp
from jax.experimental import pallas as pl
from jax.experimental.pallas import tpu as pltpu

_LANE = 128          # lane width: feature dims padded to this
_SUBLANE = 8         # sublane width: batch padded to this (activations are f32)
_MAX_BATCH_TILE = 128  # batch tile per grid step once batch is large


def _round_up(n: int, m: int) -> int:
    return ((n + m - 1) // m) * m


def _mlp_fused_kernel(*refs, n_layers: int, out_dims_padded):
    """Whole-MLP forward on one (TILE_B, .) batch tile.

    refs = (x_ref, w0_ref, ..., w{L-1}_ref, bias_ref, o_ref)
      x_ref:   (TILE_B, In0_p)  f32
      wi_ref:  (Ini_p, Outi_p)  bf16   (pre-transposed, lane-dense padded)
      bias_ref:(L, max_Out_p)   f32    (all biases stacked)
      o_ref:   (TILE_B, OutL_p) f32
    """
    x_ref = refs[0]
    w_refs = refs[1:1 + n_layers]
    b_ref = refs[1 + n_layers]
    o_ref = refs[2 + n_layers]

    h = x_ref[...]                                   # f32
    for i in range(n_layers):
        out_p = out_dims_padded[i]
        # bf16 operands on the MXU, f32 accumulate.
        acc = jnp.dot(h.astype(jnp.bfloat16), w_refs[i][...],
                      preferred_element_type=jnp.float32)
        h = acc + b_ref[i:i + 1, :out_p]             # f32 bias add (VPU)
        if i < n_layers - 1:
            h = jnp.tanh(h)                          # f32 tanh (EUP)
    o_ref[...] = h.astype(o_ref.dtype)


def _mlp_forward(x, weights, bias_stack, *, sizes, in_dim_padded, out_dims_padded):
    """pad -> fused pallas_call (batch-tiled grid) -> slice.  Meant to be jitted."""
    n_layers = len(weights)
    out_last_p = out_dims_padded[-1]
    batch, in_dim = x.shape

    bp = _round_up(max(batch, _SUBLANE), _SUBLANE)
    if bp >= _MAX_BATCH_TILE:
        tile_b = _MAX_BATCH_TILE
        bp = _round_up(bp, tile_b)
    else:
        tile_b = bp
    grid = (bp // tile_b,)

    # Zero-pad input to (Bp, In0_p).  Padded feature columns stay zero through
    # the net; padded batch rows do not (see header note) and are sliced off.
    x_p = jnp.zeros((bp, in_dim_padded), jnp.float32).at[:batch, :in_dim].set(
        x.astype(jnp.float32))

    operands = [x_p, *weights, bias_stack]
    in_specs = [pl.BlockSpec((tile_b, in_dim_padded), lambda i: (i, 0))]
    in_specs += [pl.BlockSpec(w.shape, lambda i: (0, 0)) for w in weights]
    in_specs += [pl.BlockSpec(bias_stack.shape, lambda i: (0, 0))]
    out_specs = pl.BlockSpec((tile_b, out_last_p), lambda i: (i, 0))

    # Advisory cost estimate for XLA's scheduler.
    flops = 0
    transcendentals = 0
    bytes_accessed = x_p.size * 4 + bp * out_last_p * 4 + bias_stack.size * 4
    for li, w in enumerate(weights):
        flops += 2 * bp * w.shape[0] * w.shape[1] + bp * w.shape[1]
        bytes_accessed += w.size * 2          # bf16 weights
        if li < n_layers - 1:
            transcendentals += bp * w.shape[1]

    # VMEM limit from the actual footprint: double-buffered blocks + f32
    # intermediates + headroom (v7x scoped default is 32 MiB of 64 MiB total).
    block_bytes = (tile_b * in_dim_padded * 4 + tile_b * out_last_p * 4
                   + sum(int(w.size) * 2 for w in weights)
                   + int(bias_stack.size) * 4)
    interm_bytes = sum(tile_b * d * 4 for d in out_dims_padded)
    vmem_limit = _round_up(2 * block_bytes + 2 * interm_bytes + (2 << 20), 1 << 20)
    vmem_limit = min(int(vmem_limit), 64 * 1024 * 1024)

    kernel = functools.partial(_mlp_fused_kernel, n_layers=n_layers,
                               out_dims_padded=out_dims_padded)
    out_p = pl.pallas_call(
        kernel,
        out_shape=jax.ShapeDtypeStruct((bp, out_last_p), jnp.float32),
        grid=grid,
        in_specs=in_specs,
        out_specs=out_specs,
        cost_estimate=pl.CostEstimate(
            flops=int(flops),
            transcendentals=int(transcendentals),
            bytes_accessed=int(bytes_accessed),
        ),
        compiler_params=pltpu.CompilerParams(
            dimension_semantics=("parallel",),   # batch tiles -> both v7x TCs
            vmem_limit_bytes=vmem_limit,
        ),
    )(*operands)
    return out_p[:batch, :sizes[-1]]


class MLPPallas:
    """Mirror of the PyTorch MLP: Linear layers with Tanh between them."""

    def __init__(self, sizes, bias=True, key=None):
        if key is None:
            key = jax.random.PRNGKey(0)
        self.sizes = tuple(sizes)
        self.bias = bias
        n_layers = len(sizes) - 1

        self.params = []       # PyTorch layout (out, in), (out,) — for reference
        weights_bf16 = []      # kernel layout: (in_p, out_p) bf16, lane-dense
        out_dims_padded = []

        for i in range(n_layers):
            fan_in, fan_out = sizes[i], sizes[i + 1]
            key, wk, bk = jax.random.split(key, 3)
            # Deterministic init mimicking nn.Linear's uniform(-1/sqrt(in), 1/sqrt(in)).
            bound = 1.0 / (fan_in ** 0.5)
            w = jax.random.uniform(wk, (fan_out, fan_in), jnp.float32, -bound, bound)
            if bias:
                b = jax.random.uniform(bk, (fan_out,), jnp.float32, -bound, bound)
            else:
                b = jnp.zeros((fan_out,), jnp.float32)
            self.params.append((w, b))

            in_p = _round_up(fan_in, _LANE)
            out_p = _round_up(fan_out, _LANE)
            out_dims_padded.append(out_p)
            # One-time: transpose + zero-pad + cast to bf16 (MXU-native operand).
            w_t = jnp.zeros((in_p, out_p), jnp.float32).at[:fan_in, :fan_out].set(w.T)
            weights_bf16.append(w_t.astype(jnp.bfloat16))

        max_out_p = max(out_dims_padded)
        bias_stack = jnp.zeros((n_layers, max_out_p), jnp.float32)
        for i in range(n_layers):
            fan_out = sizes[i + 1]
            bias_stack = bias_stack.at[i, :fan_out].set(self.params[i][1])

        self.weights_bf16 = tuple(weights_bf16)
        self.bias_stack = bias_stack
        self.in_dim_padded = _round_up(sizes[0], _LANE)
        self.out_dims_padded = tuple(out_dims_padded)

        # One jitted callable for the whole forward path (pad -> kernel -> slice).
        self._forward = jax.jit(functools.partial(
            _mlp_forward,
            sizes=self.sizes,
            in_dim_padded=self.in_dim_padded,
            out_dims_padded=self.out_dims_padded,
        ))

    def __call__(self, x):
        return self._forward(x, self.weights_bf16, self.bias_stack)


def _reference_bf16(x, params):
    """Pure-JAX reference with the same numerics (bf16 matmul operands,
    f32 accumulate, f32 bias + tanh), PyTorch-layout params."""
    n = len(params)
    h = x.astype(jnp.float32)
    for i, (w, b) in enumerate(params):
        h = jnp.dot(h.astype(jnp.bfloat16), w.T.astype(jnp.bfloat16),
                    preferred_element_type=jnp.float32) + b
        if i < n - 1:
            h = jnp.tanh(h)
    return h


if __name__ == "__main__":
    key = jax.random.PRNGKey(0)
    sizes = (32, 64, 48, 16)   # three Linear layers, Tanh after the first two
    batch = 8

    kx, kp = jax.random.split(key)
    x = jax.random.normal(kx, (batch, sizes[0]), jnp.float32)

    mlp = MLPPallas(sizes, bias=True, key=kp)
    out = jax.block_until_ready(mlp(x))

    ref = _reference_bf16(x, mlp.params)
    assert out.shape == (batch, sizes[-1])
    assert jnp.allclose(out, ref, atol=1e-4, rtol=1e-4), "mismatch vs JAX reference"

    print("KERNEL_OK")
</pallas_src>

<mosaic_0001>
module attributes {stable_mosaic.version = 11 : i64} {
  func.func @_mlp_fused_kernel(%arg0: i32, %arg1: memref<8x128xf32, #tpu.memory_space<vmem>>, %arg2: memref<128x128xbf16, #tpu.memory_space<vmem>>, %arg3: memref<128x128xbf16, #tpu.memory_space<vmem>>, %arg4: memref<128x128xbf16, #tpu.memory_space<vmem>>, %arg5: memref<3x128xf32, #tpu.memory_space<vmem>>, %arg6: memref<8x128xf32, #tpu.memory_space<vmem>>) attributes {dimension_semantics = [#tpu.dimension_semantics<parallel>], iteration_bounds = array<i64: 1>, scalar_prefetch = 0 : i64, scratch_operands = 0 : i64, tpu.core_type = #tpu.core_type<tc>, window_params = [{transform_indices = @transform_0, window_bounds = array<i64: 8, 128>}, {pipeline_mode = #tpu.pipeline_mode<synchronous>, transform_indices = @transform_1, window_bounds = array<i64: 128, 128>}, {pipeline_mode = #tpu.pipeline_mode<synchronous>, transform_indices = @transform_2, window_bounds = array<i64: 128, 128>}, {pipeline_mode = #tpu.pipeline_mode<synchronous>, transform_indices = @transform_3, window_bounds = array<i64: 128, 128>}, {pipeline_mode = #tpu.pipeline_mode<synchronous>, transform_indices = @transform_4, window_bounds = array<i64: 3, 128>}, {transform_indices = @transform_5, window_bounds = array<i64: 8, 128>}]} {
    %c0 = arith.constant 0 : index
    %c0_0 = arith.constant 0 : index
    %0 = vector.load %arg1[%c0, %c0_0] : memref<8x128xf32, #tpu.memory_space<vmem>>, vector<8x128xf32>
    %1 = arith.truncf %0 : vector<8x128xf32> to vector<8x128xbf16>
    %c0_1 = arith.constant 0 : index
    %c0_2 = arith.constant 0 : index
    %2 = vector.load %arg2[%c0_1, %c0_2] : memref<128x128xbf16, #tpu.memory_space<vmem>>, vector<128x128xbf16>
    %cst = arith.constant dense<0.000000e+00> : vector<8x128xf32>
    %3 = tpu.matmul %1, %2, %cst {dimension_numbers = #tpu.dot_dimension_numbers<[1], [0], [0], [1], [0, 0, 1, 1], [], []>} : vector<8x128xbf16>, vector<128x128xbf16>, vector<8x128xf32> -> vector<8x128xf32>
    %c0_3 = arith.constant 0 : index
    %c0_4 = arith.constant 0 : index
    %4 = vector.load %arg5[%c0_3, %c0_4] : memref<3x128xf32, #tpu.memory_space<vmem>>, vector<1x128xf32>
    %5 = vector.broadcast %4 : vector<1x128xf32> to vector<8x128xf32>
    %6 = arith.addf %3, %5 : vector<8x128xf32>
    %7 = math.tanh %6 : vector<8x128xf32>
    %8 = arith.truncf %7 : vector<8x128xf32> to vector<8x128xbf16>
    %c0_5 = arith.constant 0 : index
    %c0_6 = arith.constant 0 : index
    %9 = vector.load %arg3[%c0_5, %c0_6] : memref<128x128xbf16, #tpu.memory_space<vmem>>, vector<128x128xbf16>
    %cst_7 = arith.constant dense<0.000000e+00> : vector<8x128xf32>
    %10 = tpu.matmul %8, %9, %cst_7 {dimension_numbers = #tpu.dot_dimension_numbers<[1], [0], [0], [1], [0, 0, 1, 1], [], []>} : vector<8x128xbf16>, vector<128x128xbf16>, vector<8x128xf32> -> vector<8x128xf32>
    %c1 = arith.constant 1 : index
    %c0_8 = arith.constant 0 : index
    %11 = vector.load %arg5[%c1, %c0_8] : memref<3x128xf32, #tpu.memory_space<vmem>>, vector<1x128xf32>
    %12 = vector.broadcast %11 : vector<1x128xf32> to vector<8x128xf32>
    %13 = arith.addf %10, %12 : vector<8x128xf32>
    %14 = math.tanh %13 : vector<8x128xf32>
    %15 = arith.truncf %14 : vector<8x128xf32> to vector<8x128xbf16>
    %c0_9 = arith.constant 0 : index
    %c0_10 = arith.constant 0 : index
    %16 = vector.load %arg4[%c0_9, %c0_10] : memref<128x128xbf16, #tpu.memory_space<vmem>>, vector<128x128xbf16>
    %cst_11 = arith.constant dense<0.000000e+00> : vector<8x128xf32>
    %17 = tpu.matmul %15, %16, %cst_11 {dimension_numbers = #tpu.dot_dimension_numbers<[1], [0], [0], [1], [0, 0, 1, 1], [], []>} : vector<8x128xbf16>, vector<128x128xbf16>, vector<8x128xf32> -> vector<8x128xf32>
    %c2 = arith.constant 2 : index
    %c0_12 = arith.constant 0 : index
    %18 = vector.load %arg5[%c2, %c0_12] : memref<3x128xf32, #tpu.memory_space<vmem>>, vector<1x128xf32>
    %19 = vector.broadcast %18 : vector<1x128xf32> to vector<8x128xf32>
    %20 = arith.addf %17, %19 : vector<8x128xf32>
    %c0_13 = arith.constant 0 : index
    %c0_14 = arith.constant 0 : index
    %21 = vector.load %arg6[%c0_13, %c0_14] : memref<8x128xf32, #tpu.memory_space<vmem>>, vector<8x128xf32>
    tpu.vector_store %arg6[%c0_13, %c0_14], %20 {strides = array<i32>} : memref<8x128xf32, #tpu.memory_space<vmem>>, vector<8x128xf32>,
    return
  }
  func.func @transform_0(%arg0: i32) -> (i32, i32) {
    %c0_i32 = arith.constant 0 : i32
    %c0_i32_0 = arith.constant 0 : i32
    return %arg0, %c0_i32 : i32, i32
  }
  func.func @transform_1(%arg0: i32) -> (i32, i32) {
    %c0_i32 = arith.constant 0 : i32
    %c0_i32_0 = arith.constant 0 : i32
    %c0_i32_1 = arith.constant 0 : i32
    return %c0_i32, %c0_i32_0 : i32, i32
  }
  func.func @transform_2(%arg0: i32) -> (i32, i32) {
    %c0_i32 = arith.constant 0 : i32
    %c0_i32_0 = arith.constant 0 : i32
    %c0_i32_1 = arith.constant 0 : i32
    return %c0_i32, %c0_i32_0 : i32, i32
  }
  func.func @transform_3(%arg0: i32) -> (i32, i32) {
    %c0_i32 = arith.constant 0 : i32
    %c0_i32_0 = arith.constant 0 : i32
    %c0_i32_1 = arith.constant 0 : i32
    return %c0_i32, %c0_i32_0 : i32, i32
  }
  func.func @transform_4(%arg0: i32) -> (i32, i32) {
    %c0_i32 = arith.constant 0 : i32
    %c0_i32_0 = arith.constant 0 : i32
    %c0_i32_1 = arith.constant 0 : i32
    return %c0_i32, %c0_i32_0 : i32, i32
  }
  func.func @transform_5(%arg0: i32) -> (i32, i32) {
    %c0_i32 = arith.constant 0 : i32
    %c0_i32_0 = arith.constant 0 : i32
    return %arg0, %c0_i32 : i32, i32
  }
}

</mosaic_0001>

<bundles_post_ra>
// kernel: _mlp_forward.1
= control target key start
LH: loop header
LB: loop body
LE: loop exit
PB: predicated region body
PF: predicated region fallthrough
CT: control target
= control target key end

     0   :  { %10 = vsyncpa [#allocation3], 0  ;;  %s801_s0 = inlined_call_operand.vmem [shape: f32[8,128], index: 0, kind: input, shape index: {}]   ;;  %s802_s1 = inlined_call_operand.hbm [shape: bf16[128,128], index: 1, kind: input, shape index: {}]   ;;  %s803_s2 = inlined_call_operand.hbm [shape: bf16[128,128], index: 2, kind: input, shape index: {}]   ;;  %s804_s3 = inlined_call_operand.hbm [shape: bf16[128,128], index: 3, kind: input, shape index: {}]   ;;  %s805_s4 = inlined_call_operand.vmem [shape: f32[3,128], index: 4, kind: input, shape index: {}]   ;;  %s806_s5 = inlined_call_operand.hbm [shape: f32[8,128], index: 5, kind: output, shape index: {}]  }
   0x1   :  { %11 = vsyncpa [#allocation6], 0 }
   0x2   :  { %12 = vsyncpa [#allocation4], 0  ;;  %s657_s18 = smov [#allocation5]   ;;  %s658_s20 = smov [#allocation2]  }
   0x3   :  { %s32_s19 = sshll.u32 %s657_s18, 4  ;;  %s20_s21 = sshll.u32 %s658_s20, 4  ;;  %s33_s19 = int_to_ptr.vmem [resolvable:$true] %s32_s19  ;;  %s695_s21 = int_to_ptr.vmem [resolvable:$true] %s20_s21 }
   0x4   :  { %s563_s24 = scalar_lea.hbm %s803_s2, 1024 }
   0x5   :  { %p564_p0 = scmp.ne.s32.totalorder %s803_s2, %s563_s24  ;;  %p567_p1 = scmp.lt.u32.totalorder %s563_s24, %s803_s2 }
   0x7   :  { %p569_p2 = pnand %p567_p1, %p564_p0 }
   0x9   :  { %572 = shalt.err (!%p569_p2)
}
   0xa   :  { %s573_s29 = scalar_lea.vmem %s33_s19, 1024  ;;  %p578_p4 = scmp.lt.s32.totalorder %s33_s19, %s33_s19 }
   0xb   :  { %p574_p3 = scmp.ne.s32.totalorder %s33_s19, %s573_s29  ;;  %p579_p5 = scmp.lt.s32.totalorder %s573_s29, %s573_s29 }
   0xd   :  { %p580_p6 = por %p579_p5, %p578_p4 }
   0xf   :  { %p581_p7 = pnand %p580_p6, %p574_p3 }
  0x11   :  { %584 = shalt.err (!%p581_p7)
}
  0x12   :  { %s659_s30 = smov 64   ;;  %s660_s6 = smov 4  }
  0x13   :  { %38 = dma.hbm_to_vmem [thread:$0]  %s803_s2, 1024, %s33_s19, [#allocation6], %s659_s30, %s659_s30, %s660_s6  }
  0x14   :  { %s585_s11 = scalar_lea.hbm %s802_s1, 1024 }
  0x15   :  { %p586_p8 = scmp.ne.s32.totalorder %s802_s1, %s585_s11  ;;  %p589_p9 = scmp.lt.u32.totalorder %s585_s11, %s802_s1 }
  0x17   :  { %p591_p10 = pnand %p589_p9, %p586_p8 }
  0x19   :  { %594 = shalt.err (!%p591_p10)
}
  0x1a   :  { %s595_s16 = scalar_lea.vmem %s695_s21, 1024  ;;  %p600_p12 = scmp.lt.s32.totalorder %s695_s21, %s695_s21 }
  0x1b   :  { %p596_p11 = scmp.ne.s32.totalorder %s695_s21, %s595_s16  ;;  %p601_p13 = scmp.lt.s32.totalorder %s595_s16, %s595_s16 }
  0x1d   :  { %p602_p0 = por %p601_p13, %p600_p12 }
  0x1f   :  { %p603_p1 = pnand %p602_p0, %p596_p11 }
  0x21   :  { %606 = shalt.err (!%p603_p1)
}
  0x22   :  { %26 = dma.hbm_to_vmem [thread:$0]  %s802_s1, 1024, %s695_s21, [#allocation3], %s659_s30, %s659_s30, %s660_s6  }
  0x23   :  { %s661_s18 = smov [#allocation7]   ;;  %s607_s23 = scalar_lea.hbm %s804_s3, 1024 }
  0x24   :  { %s44_s19 = sshll.u32 %s661_s18, 4  ;;  %p608_p2 = scmp.ne.s32.totalorder %s804_s3, %s607_s23  ;;  %s45_s19 = int_to_ptr.vmem [resolvable:$true] %s44_s19 }
  0x25   :  { %p611_p3 = scmp.lt.u32.totalorder %s607_s23, %s804_s3 }
  0x27   :  { %p613_p4 = pnand %p611_p3, %p608_p2 }
  0x29   :  { %616 = shalt.err (!%p613_p4)
}
  0x2a   :  { %s617_s28 = scalar_lea.vmem %s45_s19, 1024  ;;  %p622_p6 = scmp.lt.s32.totalorder %s45_s19, %s45_s19 }
  0x2b   :  { %p618_p5 = scmp.ne.s32.totalorder %s45_s19, %s617_s28  ;;  %p623_p7 = scmp.lt.s32.totalorder %s617_s28, %s617_s28 }
  0x2d   :  { %p624_p8 = por %p623_p7, %p622_p6 }
  0x2f   :  { %p625_p9 = pnand %p624_p8, %p618_p5 }
  0x31   :  { %628 = shalt.err (!%p625_p9)
}
  0x32   :  { %50 = dma.hbm_to_vmem [thread:$0]  %s804_s3, 1024, %s45_s19, [#allocation6], %s659_s30, %s659_s30, %s660_s6  }
  0x33   :  { %651 = dma.done.wait [#allocation3], 1024  }
  0x34   :  { %652 = vsyncadd [#allocation3], 4294966272 }
  0x35   :  { %653 = dma.done.wait [#allocation6], 2048  }
  0x36   :  { %654 = vsyncadd [#allocation6], 4294965248  ;;  %v662_v0 = vmov 0.0   ;;  %vm663_vm0 = vmmov 0   ;;  %v535_v1 = vld [vmem:[#allocation2] sm:$0xff]   ;;  %v536_v2 = vld [vmem:[#allocation2 + $0x8] sm:$0xff]  }
  0x37   :  { %467 = vmatprep.subr.bf16.mxu0 %v662_v0  ;;  %483 = vmatprep.mubr.msk.bf16.mxu0 %vm663_vm0, %v662_v0  ;;  %v537_v3 = vld [vmem:[#allocation2 + $0x10] sm:$0xff]   ;;  %v543_v4 = vld [vmem:[#allocation5] sm:$0xff]   ;;  %v538_v5 = vld [vmem:[#allocation2 + $0x18] sm:$0xff]   ;;  %s664_s10 = smov [#allocation8]  }
  0x38   :  { %487 = vmatprep.subr.bf16.mxu1 %v662_v0  ;;  %503 = vmatprep.mubr.msk.bf16.mxu1 %vm663_vm0, %v662_v0  ;;  %v544_v6 = vld [vmem:[#allocation5 + $0x8] sm:$0xff]   ;;  %v539_v7 = vld [vmem:[#allocation2 + $0x20] sm:$0xff]   ;;  %v545_v8 = vld [vmem:[#allocation5 + $0x10] sm:$0xff]   ;;  %s403_s11 = sshll.u32 %s664_s10, 4  ;;  %s404_s11 = int_to_ptr.vmem [resolvable:$true] %s403_s11 }
  0x39   :  { %468 = vmatpush3.bf16.msra.mxu0 %v535_v1  ;;  %488 = vmatpush3.bf16.msra.mxu1 %v543_v4  ;;  %v540_v9 = vld [vmem:[#allocation2 + $0x28] sm:$0xff]   ;;  %v546_v10 = vld [vmem:[#allocation5 + $0x18] sm:$0xff]   ;;  %v541_v11 = vld [vmem:[#allocation2 + $0x30] sm:$0xff]   ;;  %s629_s12 = scalar_lea.vmem %s404_s11, 128  ;;  %p634_p11 = scmp.lt.s32.totalorder %s404_s11, %s404_s11 }
  0x3a   :  { %469 = vmatprep.subr.bf16.mxu0 %v662_v0  ;;  %489 = vmatprep.subr.bf16.mxu1 %v662_v0  ;;  %v542_v12 = vld [vmem:[#allocation2 + $0x38] sm:$0xff]   ;;  %v63_v13 = vld [vmem:[%s801_s0] sm:$0xff]  ;;  %v548_v16 = vld [vmem:[#allocation5 + $0x28] sm:$0xff]   ;;  %p630_p10 = scmp.ne.s32.totalorder %s404_s11, %s629_s12  ;;  %p635_p12 = scmp.lt.s32.totalorder %s629_s12, %s629_s12 }
  0x3b   :  { %v64_v14 = vpack.c.bf16 %v63_v13, %v63_v13  ;;  %v547_v15 = vld [vmem:[#allocation5 + $0x20] sm:$0xff]   ;;  %v549_v17 = vld [vmem:[#allocation5 + $0x30] sm:$0xff]   ;;  %v550_v18 = vld [vmem:[#allocation5 + $0x38] sm:$0xff]  }
  0x3c   :  { %v551_v19 = vld [vmem:[#allocation7] sm:$0xff]   ;;  %v552_v20 = vld [vmem:[#allocation7 + $0x8] sm:$0xff]   ;;  %v553_v21 = vld [vmem:[#allocation7 + $0x10] sm:$0xff]   ;;  %p636_p13 = por %p635_p12, %p634_p11 }
  0x3d   :  { %470 = vmatpush3.bf16.msra.mxu0 %v536_v2  ;;  %490 = vmatpush3.bf16.msra.mxu1 %v544_v6  ;;  %v554_v22 = vld [vmem:[#allocation7 + $0x18] sm:$0xff]   ;;  %v413_v23 = vld [vmem:[%s805_s4] ss:$0 sm:$0xff]  ;;  %v556_v32 = vld [vmem:[#allocation7 + $0x28] sm:$0xff]  }
  0x3e   :  { %471 = vmatprep.subr.bf16.mxu0 %v662_v0  ;;  %491 = vmatprep.subr.bf16.mxu1 %v662_v0  ;;  %v555_v31 = vld [vmem:[#allocation7 + $0x20] sm:$0xff]   ;;  %v557_v33 = vld [vmem:[#allocation7 + $0x30] sm:$0xff]   ;;  %v558_v34 = vld [vmem:[#allocation7 + $0x38] sm:$0xff]   ;;  %p637_p0 = pnand %p636_p13, %p630_p10 }
  0x3f   :  { %v422_v35 = vld [vmem:[%s805_s4 + $0x1] ss:$0 sm:$0xff]  ;;  %v431_v43 = vld [vmem:[%s805_s4 + $0x2] ss:$0 sm:$0xff] }
  0x41   :  { %472 = vmatpush3.bf16.msra.mxu0 %v537_v3  ;;  %492 = vmatpush3.bf16.msra.mxu1 %v545_v8 }
  0x42   :  { %473 = vmatprep.subr.bf16.mxu0 %v662_v0  ;;  %493 = vmatprep.subr.bf16.mxu1 %v662_v0 }
  0x45   :  { %474 = vmatpush3.bf16.msra.mxu0 %v538_v5  ;;  %494 = vmatpush3.bf16.msra.mxu1 %v546_v10 }
  0x46   :  { %475 = vmatprep.subr.bf16.mxu0 %v662_v0  ;;  %495 = vmatprep.subr.bf16.mxu1 %v662_v0 }
  0x49   :  { %476 = vmatpush3.bf16.msra.mxu0 %v539_v7  ;;  %496 = vmatpush3.bf16.msra.mxu1 %v547_v15 }
  0x4a   :  { %477 = vmatprep.subr.bf16.mxu0 %v662_v0  ;;  %497 = vmatprep.subr.bf16.mxu1 %v662_v0 }
  0x4d   :  { %478 = vmatpush3.bf16.msra.mxu0 %v540_v9  ;;  %498 = vmatpush3.bf16.msra.mxu1 %v548_v16 }
  0x4e   :  { %479 = vmatprep.subr.bf16.mxu0 %v662_v0  ;;  %499 = vmatprep.subr.bf16.mxu1 %v662_v0 }
  0x51   :  { %480 = vmatpush3.bf16.msra.mxu0 %v541_v11  ;;  %500 = vmatpush3.bf16.msra.mxu1 %v549_v17 }
  0x52   :  { %481 = vmatprep.subr.bf16.mxu0 %v662_v0  ;;  %501 = vmatprep.subr.bf16.mxu1 %v662_v0 }
  0x55   :  { %482 = vmatpush3.bf16.msra.mxu0 %v542_v12  ;;  %502 = vmatpush3.bf16.msra.mxu1 %v550_v18 }
  0x56   :  { %507 = vmatprep.subr.bf16.mxu0 %v662_v0 }
  0x58   :  { %484 = vmatmul.mubr.bf16.vlgmr.msra.gmra.mrb[0].mxu0 %v64_v14 }
  0x59   :  { %523 = vmatprep.mubr.msk.bf16.mxu0 %vm663_vm0, %v662_v0  ;;  %508 = vmatpush3.bf16.msra.mxu0 %v551_v19 }
  0x5a   :  { %509 = vmatprep.subr.bf16.mxu0 %v662_v0 }
  0x5d   :  { %510 = vmatpush3.bf16.msra.mxu0 %v552_v20 }
  0x5e   :  { %511 = vmatprep.subr.bf16.mxu0 %v662_v0 }
  0x61   :  { %512 = vmatpush3.bf16.msra.mxu0 %v553_v21 }
  0x62   :  { %513 = vmatprep.subr.bf16.mxu0 %v662_v0 }
  0x65   :  { %514 = vmatpush3.bf16.msra.mxu0 %v554_v22 }
  0x66   :  { %515 = vmatprep.subr.bf16.mxu0 %v662_v0 }
  0x69   :  { %516 = vmatpush3.bf16.msra.mxu0 %v555_v31 }
  0x6a   :  { %517 = vmatprep.subr.bf16.mxu0 %v662_v0 }
  0x6d   :  { %518 = vmatpush3.bf16.msra.mxu0 %v556_v32 }
  0x6e   :  { %519 = vmatprep.subr.bf16.mxu0 %v662_v0 }
  0x71   :  { %520 = vmatpush3.bf16.msra.mxu0 %v557_v33 }
  0x72   :  { %521 = vmatprep.subr.bf16.mxu0 %v662_v0 }
  0x75   :  { %522 = vmatpush3.bf16.msra.mxu0 %v558_v34 }
 0x12b   :  { %v168_v24 = vpop.f32.mrb[0].mxu0 }
 0x12c   :  { %v169_v25 = vadd.f32 %v413_v23, %v168_v24  ;;  %v485_v26 = vpop.f32.mrb[1].mxu0 }
 0x12d   :  { %v171_v27 = vpop.f32.mrb[2].mxu0 }
 0x12e   :  { %559 = vtanh.f32 %v169_v25  ;;  %v486_v28 = vpop.f32.mrb[3].mxu0 }
 0x138   :  { %v560_v29 = vpop.eup %559 }
 0x139   :  { %v175_v30 = vpack.c.bf16 %v560_v29, %v560_v29 }
 0x13b   :  { %504 = vmatmul.mubr.bf16.vlgmr.msra.gmra.mrb[0].mxu1 %v175_v30 }
 0x20e   :  { %v279_v36 = vpop.f32.mrb[0].mxu1 }
 0x20f   :  { %v280_v37 = vadd.f32 %v422_v35, %v279_v36  ;;  %v505_v38 = vpop.f32.mrb[1].mxu1 }
 0x210   :  { %v282_v39 = vpop.f32.mrb[2].mxu1 }
 0x211   :  { %561 = vtanh.f32 %v280_v37  ;;  %v506_v40 = vpop.f32.mrb[3].mxu1 }
 0x21b   :  { %v562_v41 = vpop.eup %561 }
 0x21c   :  { %v286_v42 = vpack.c.bf16 %v562_v41, %v562_v41 }
 0x21e   :  { %524 = vmatmul.mubr.bf16.vlgmr.msra.gmra.mrb[4].mxu0 %v286_v42 }
 0x2f1   :  { %v390_v44 = vpop.f32.mrb[4].mxu0 }
 0x2f2   :  { %v391_v45 = vadd.f32 %v431_v43, %v390_v44  ;;  %v525_v46 = vpop.f32.mrb[5].mxu0 }
 0x2f3   :  { %v393_v47 = vpop.f32.mrb[6].mxu0 }
 0x2f4   :  { %396 = vst [vmem:[#allocation8] sm:$0xff] %v391_v45  ;;  %v526_v48 = vpop.f32.mrb[7].mxu0 }
 0x2f5   :  { %640 = shalt.err (!%p637_p0)
}
 0x2f6   :  { %s641_s4 = scalar_lea.hbm %s806_s5, 128 }
 0x2f7   :  { %p642_p1 = scmp.ne.s32.totalorder %s806_s5, %s641_s4  ;;  %p645_p2 = scmp.lt.u32.totalorder %s641_s4, %s806_s5 }
 0x2f9   :  { %p647_p3 = pnand %p645_p2, %p642_p1 }
 0x2fb   :  { %650 = shalt.err (!%p647_p3)
}
 0x2fc   :  { %406 = dma.vmem_to_hbm [thread:$0]  %s404_s11, 128, %s806_s5, [#allocation4]  }
 0x2fd   :  { %655 = dma.done.wait [#allocation4], 128  }
 0x2fe   :  { %656 = vsyncadd [#allocation4], 4294967168 }
 0x2ff   :  { %410 = vsyncpa [#allocation3], 1 }
 0x300   :  { %411 = vsyncpa [#allocation6], 1 }
 0x301   :  { %412 = vsyncpa [#allocation4], 1 }

</bundles_post_ra>
